<compile_context>
chip_gen: v7x
topology: tpu7x:2x2x1
jax: 0.10.0
libtpu: 0.0.40
codegen_flags: <defaults>
</compile_context>

<pallas_src>
import functools

import jax
import jax.numpy as jnp
from jax.experimental import pallas as pl
from jax.experimental.pallas import tpu as pltpu

_NUM_CLASSES = 6


def _round_up(x, m):
    return (x + m - 1) // m * m


def _l2loss_kernel(logits_ref, label_ref, out_ref, *, n):
    # logits_ref: (C, TN) native float dtype
    # label_ref:  (1, TN) int32
    # out_ref:    (1, 8, 128) f32 per-block partial sum (broadcast scalar)
    pid = pl.program_id(0)
    c, tn = logits_ref.shape

    x = logits_ref[...].astype(jnp.float32)                       # (C, TN)
    lbl = label_ref[...]                                          # (1, TN)

    # Numerically-stable softmax pieces over the class (sublane) axis.
    m = jnp.max(x, axis=0, keepdims=True)                         # (1, TN)
    e = jnp.exp(x - m)                                            # (C, TN)
    denom = jnp.sum(e, axis=0, keepdims=True)                     # (1, TN)
    r = pl.reciprocal(denom)                                      # exact, (1, TN)

    # sum_c (p_c - onehot_c)^2 == r^2 * sum(e^2) - 2 * r * e[label] + 1
    classes = jax.lax.broadcasted_iota(jnp.int32, x.shape, 0)     # (C, TN)
    e_lab = jnp.sum(jnp.where(classes == lbl, e, 0.0),
                    axis=0, keepdims=True)                        # (1, TN)
    s2 = jnp.sum(e * e, axis=0, keepdims=True)                    # (1, TN)
    per_col = (r * r) * s2 - 2.0 * (r * e_lab) + 1.0              # (1, TN)

    # Mask the ragged tail (columns beyond n); garbage in the partial block
    # (possibly NaN/inf) is column-local and gets replaced by exact 0.0 here.
    col = pid * tn + jax.lax.broadcasted_iota(jnp.int32, (1, tn), 1)
    per_col = jnp.where(col < n, per_col, 0.0)

    partial = jnp.sum(per_col)                                    # f32 scalar
    out_ref[...] = jnp.zeros_like(out_ref) + partial              # lane-dense store


def l2_loss(model_output, label, *, tile_n=32768):
    """model_output: (N, C) float (any float dtype); label: (N,) or (N, 1) int.

    Returns scalar mean_n sum_c (softmax(model_output)_nc - onehot(label)_nc)^2.
    """
    n, c = model_output.shape
    tile_n = _round_up(max(int(tile_n), 128), 128)   # lane tile must be 128-aligned
    tn = min(tile_n, _round_up(n, 128))
    grid_n = pl.cdiv(n, tn)

    # Put N on lanes, C on sublanes; keep native dtype (no HBM f32 copy).
    # TODO(synk): have the producer emit (C, N) directly to drop this transpose.
    logits_t = model_output.T                                   # (C, N)
    lbl = label.reshape(-1).astype(jnp.int32).reshape(1, n)     # (1, N)

    kernel = functools.partial(_l2loss_kernel, n=n)
    itemsize = jnp.dtype(model_output.dtype).itemsize
    cost = pl.CostEstimate(
        flops=10 * n * c,
        transcendentals=n * (c + 1),
        bytes_accessed=n * c * itemsize + n * 4 + grid_n * 8 * 128 * 4,
    )

    partials = pl.pallas_call(
        kernel,
        out_shape=jax.ShapeDtypeStruct((grid_n, 8, 128), jnp.float32),
        grid=(grid_n,),
        in_specs=[
            pl.BlockSpec((c, tn), lambda i: (0, i)),   # logits (C, TN)
            pl.BlockSpec((1, tn), lambda i: (0, i)),   # labels (1, TN)
        ],
        out_specs=pl.BlockSpec((1, 8, 128), lambda i: (i, 0, 0)),
        compiler_params=pltpu.CompilerParams(
            # Per-block partials are independent -> "parallel" lets Mosaic
            # shard the grid across both TensorCores on v7x; on v5e/v6e it
            # simply runs serially with BlockSpec double-buffering.
            dimension_semantics=("parallel",),
            vmem_limit_bytes=32 * 1024 * 1024,
        ),
        cost_estimate=cost,
    )(logits_t, lbl)

    # Tiny epilogue: each block's partial is broadcast across its (8,128) tile,
    # so read one element per block, sum, and scale by 1/N.
    return jnp.sum(partials[:, 0, 0]) * (1.0 / n)


def l2_loss_ref(model_output, label):
    p = jax.nn.softmax(model_output.astype(jnp.float32), axis=1)
    onehot = (label.reshape(-1)[:, None]
              == jnp.arange(_NUM_CLASSES)[None, :]).astype(jnp.float32)
    return jnp.mean(jnp.sum((p - onehot) ** 2, axis=1))


if __name__ == "__main__":
    N, C = 8, _NUM_CLASSES
    key = jax.random.PRNGKey(0)
    k1, k2 = jax.random.split(key)
    model_output = jax.random.normal(k1, (N, C), dtype=jnp.float32)
    label = jax.random.randint(k2, (N,), 0, C, dtype=jnp.int32)

    loss = jax.block_until_ready(l2_loss(model_output, label))
    ref = jax.block_until_ready(l2_loss_ref(model_output, label))
    assert jnp.allclose(loss, ref, atol=2e-3, rtol=2e-3), (loss, ref)

    # Exercise the multi-tile grid + ragged-tail mask path with bf16 inputs.
    k3, k4 = jax.random.split(k2)
    N2 = 520
    mo2 = jax.random.normal(k3, (N2, C), dtype=jnp.bfloat16)
    lb2 = jax.random.randint(k4, (N2,), 0, C, dtype=jnp.int32)
    loss2 = jax.block_until_ready(l2_loss(mo2, lb2, tile_n=256))
    ref2 = jax.block_until_ready(l2_loss_ref(mo2, lb2))
    assert jnp.allclose(loss2, ref2, atol=5e-3, rtol=5e-3), (loss2, ref2)

    print("KERNEL_OK")
</pallas_src>

<mosaic_0001>
module attributes {stable_mosaic.version = 11 : i64} {
  func.func @_l2loss_kernel(%arg0: i32, %arg1: memref<6x128xf32, #tpu.memory_space<vmem>>, %arg2: memref<1x128xi32, #tpu.memory_space<vmem>>, %arg3: memref<1x8x128xf32, #tpu.memory_space<vmem>>) attributes {dimension_semantics = [#tpu.dimension_semantics<parallel>], iteration_bounds = array<i64: 1>, scalar_prefetch = 0 : i64, scratch_operands = 0 : i64, tpu.core_type = #tpu.core_type<tc>, window_params = [{transform_indices = @transform_0, window_bounds = array<i64: 6, 128>}, {transform_indices = @transform_1, window_bounds = array<i64: 1, 128>}, {transform_indices = @transform_2, window_bounds = array<i64: 1, 8, 128>}]} {
    %c0 = arith.constant 0 : index
    %c0_0 = arith.constant 0 : index
    %0 = vector.load %arg1[%c0, %c0_0] : memref<6x128xf32, #tpu.memory_space<vmem>>, vector<6x128xf32>
    %c0_1 = arith.constant 0 : index
    %c0_2 = arith.constant 0 : index
    %1 = vector.load %arg2[%c0_1, %c0_2] : memref<1x128xi32, #tpu.memory_space<vmem>>, vector<1x128xi32>
    %cst = arith.constant dense<0xFF800000> : vector<128xf32>
    %2 = vector.multi_reduction <maximumf>, %0, %cst [0] : vector<6x128xf32> to vector<128xf32>
    %3 = vector.shape_cast %2 : vector<128xf32> to vector<1x128xf32>
    %4 = vector.broadcast %3 : vector<1x128xf32> to vector<6x128xf32>
    %5 = arith.subf %0, %4 : vector<6x128xf32>
    %6 = math.exp %5 : vector<6x128xf32>
    %cst_3 = arith.constant dense<0.000000e+00> : vector<128xf32>
    %7 = vector.multi_reduction <add>, %6, %cst_3 [0] : vector<6x128xf32> to vector<128xf32>
    %8 = vector.shape_cast %7 : vector<128xf32> to vector<1x128xf32>
    %9 = tpu.reciprocal %8 : vector<1x128xf32> -> vector<1x128xf32>
    %10 = tpu.iota {dimensions = array<i32: 0>} : vector<6x128xi32>
    %11 = vector.broadcast %1 : vector<1x128xi32> to vector<6x128xi32>
    %12 = arith.cmpi eq, %10, %11 : vector<6x128xi32>
    %cst_4 = arith.constant 0.000000e+00 : f32
    %13 = vector.broadcast %cst_4 : f32 to vector<6x128xf32>
    %14 = arith.select %12, %6, %13 : vector<6x128xi1>, vector<6x128xf32>
    %cst_5 = arith.constant dense<0.000000e+00> : vector<128xf32>
    %15 = vector.multi_reduction <add>, %14, %cst_5 [0] : vector<6x128xf32> to vector<128xf32>
    %16 = vector.shape_cast %15 : vector<128xf32> to vector<1x128xf32>
    %17 = arith.mulf %6, %6 : vector<6x128xf32>
    %cst_6 = arith.constant dense<0.000000e+00> : vector<128xf32>
    %18 = vector.multi_reduction <add>, %17, %cst_6 [0] : vector<6x128xf32> to vector<128xf32>
    %19 = vector.shape_cast %18 : vector<128xf32> to vector<1x128xf32>
    %20 = arith.mulf %9, %9 : vector<1x128xf32>
    %21 = arith.mulf %20, %19 : vector<1x128xf32>
    %22 = arith.mulf %9, %16 : vector<1x128xf32>
    %cst_7 = arith.constant 2.000000e+00 : f32
    %23 = vector.broadcast %cst_7 : f32 to vector<1x128xf32>
    %24 = arith.mulf %23, %22 : vector<1x128xf32>
    %25 = arith.subf %21, %24 : vector<1x128xf32>
    %cst_8 = arith.constant 1.000000e+00 : f32
    %26 = vector.broadcast %cst_8 : f32 to vector<1x128xf32>
    %27 = arith.addf %25, %26 : vector<1x128xf32>
    %c128_i32 = arith.constant 128 : i32
    %28 = arith.muli %arg0, %c128_i32 : i32
    %29 = tpu.iota {dimensions = array<i32: 1>} : vector<1x128xi32>
    %30 = vector.broadcast %28 : i32 to vector<1x128xi32>
    %31 = arith.addi %30, %29 : vector<1x128xi32>
    %c8_i32 = arith.constant 8 : i32
    %32 = vector.broadcast %c8_i32 : i32 to vector<1x128xi32>
    %33 = arith.cmpi slt, %31, %32 : vector<1x128xi32>
    %cst_9 = arith.constant 0.000000e+00 : f32
    %34 = vector.broadcast %cst_9 : f32 to vector<1x128xf32>
    %35 = arith.select %33, %27, %34 : vector<1x128xi1>, vector<1x128xf32>
    %36 = vector.shape_cast %35 : vector<1x128xf32> to vector<1x1x128xf32>
    %cst_10 = arith.constant dense<0.000000e+00> : vector<1xf32>
    %37 = vector.multi_reduction <add>, %36, %cst_10 [1, 2] : vector<1x1x128xf32> to vector<1xf32>
    %38 = vector.shape_cast %37 : vector<1xf32> to vector<1x1x1xf32>
    %39 = vector.extract %38[0, 0, 0] : f32 from vector<1x1x1xf32>
    %cst_11 = arith.constant 0.000000e+00 : f32
    %40 = vector.broadcast %cst_11 : f32 to vector<1x8x128xf32>
    %41 = vector.broadcast %39 : f32 to vector<1x8x128xf32>
    %42 = arith.addf %40, %41 : vector<1x8x128xf32>
    %c0_12 = arith.constant 0 : index
    %c0_13 = arith.constant 0 : index
    %c0_14 = arith.constant 0 : index
    %43 = vector.load %arg3[%c0_12, %c0_13, %c0_14] : memref<1x8x128xf32, #tpu.memory_space<vmem>>, vector<1x8x128xf32>
    tpu.vector_store %arg3[%c0_12, %c0_13, %c0_14], %42 {strides = array<i32>} : memref<1x8x128xf32, #tpu.memory_space<vmem>>, vector<1x8x128xf32>,
    return
  }
  func.func @transform_0(%arg0: i32) -> (i32, i32) {
    %c0_i32 = arith.constant 0 : i32
    %c0_i32_0 = arith.constant 0 : i32
    return %c0_i32, %arg0 : i32, i32
  }
  func.func @transform_1(%arg0: i32) -> (i32, i32) {
    %c0_i32 = arith.constant 0 : i32
    %c0_i32_0 = arith.constant 0 : i32
    return %c0_i32, %arg0 : i32, i32
  }
  func.func @transform_2(%arg0: i32) -> (i32, i32, i32) {
    %c0_i32 = arith.constant 0 : i32
    %c0_i32_0 = arith.constant 0 : i32
    %c0_i32_1 = arith.constant 0 : i32
    return %arg0, %c0_i32, %c0_i32_0 : i32, i32, i32
  }
}

</mosaic_0001>

<bundles_post_ra>
// kernel: tpu_custom_call.1
= control target key start
LH: loop header
LB: loop body
LE: loop exit
PB: predicated region body
PF: predicated region fallthrough
CT: control target
= control target key end

     0   :  { %7 = vsyncpa [#allocation3], 0  ;;  %s215_s0 = inlined_call_operand.hbm [shape: f32[6,8], index: 0, kind: input, shape index: {}]   ;;  %s216_s1 = inlined_call_operand.vmem [shape: s32[1,8], index: 1, kind: input, shape index: {}]   ;;  %s217_s2 = inlined_call_operand.hbm [shape: f32[1,8,128], index: 2, kind: output, shape index: {}]  }
   0x1   :  { %8 = vsyncpa [#allocation4], 0  ;;  %s167_s9 = smov [#allocation2]   ;;  %s119_s13 = scalar_lea.hbm %s215_s0, 128 }
   0x2   :  { %s15_s10 = sshll.u32 %s167_s9, 4  ;;  %p120_p0 = scmp.ne.s32.totalorder %s215_s0, %s119_s13  ;;  %s16_s10 = int_to_ptr.vmem [resolvable:$true] %s15_s10 }
   0x3   :  { %p123_p1 = scmp.lt.u32.totalorder %s119_s13, %s215_s0 }
   0x5   :  { %p125_p2 = pnand %p123_p1, %p120_p0 }
   0x7   :  { %128 = shalt.err (!%p125_p2)
}
   0x8   :  { %s129_s18 = scalar_lea.vmem %s16_s10, 128  ;;  %p134_p4 = scmp.lt.s32.totalorder %s16_s10, %s16_s10 }
   0x9   :  { %p130_p3 = scmp.ne.s32.totalorder %s16_s10, %s129_s18  ;;  %p135_p5 = scmp.lt.s32.totalorder %s129_s18, %s129_s18 }
   0xb   :  { %p136_p6 = por %p135_p5, %p134_p4 }
   0xd   :  { %p137_p7 = pnand %p136_p6, %p130_p3 }
   0xf   :  { %140 = shalt.err (!%p137_p7)
}
  0x10   :  { %18 = dma.hbm_to_vmem [thread:$0]  %s215_s0, 128, %s16_s10, [#allocation3]  }
  0x11   :  { %163 = dma.done.wait [#allocation3], 128  }
  0x12   :  { %164 = vsyncadd [#allocation3], 4294967168  ;;  %vm26_vm0 = vcmask 1045504   ;;  %v24_v0 = vld [vmem:[#allocation2] sm:$0x3f]  ;;  %v45_v10 = vlaneseq  ;;  %vm81_vm3 = vcmask 1040384  }
  0x13   :  { %v27_v1 = vsel %vm26_vm0, %v24_v0, -inf  ;;  %v110_v12 = vld [vmem:[%s216_s1] ss:$0 sm:$0xff]  ;;  %s168_s0 = smov [#allocation5]  }
  0x14   :  { %v28_v2 = vrot.slane %v27_v1, 4  ;;  %v46_v11 = vshrl.u32 %v45_v10, 7  ;;  %v76_v40 = vand.u32 127, %v45_v10  ;;  %s101_s1 = sshll.u32 %s168_s0, 4  ;;  %s102_s1 = int_to_ptr.vmem [resolvable:$true] %s101_s1 }
  0x15   :  { %s141_s24 = scalar_lea.vmem %s102_s1, 128  ;;  %p146_p9 = scmp.lt.s32.totalorder %s102_s1, %s102_s1 }
  0x16   :  { %v29_v3 = vmax.f32 %v27_v1, %v28_v2  ;;  %vm51_vm1 = vcmp.eq.s32.totalorder %v46_v11, %v110_v12  ;;  %vm79_vm2 = vcmp.lt.s32.totalorder %v76_v40, 8  ;;  %p142_p8 = scmp.ne.s32.totalorder %s102_s1, %s141_s24  ;;  %p147_p10 = scmp.lt.s32.totalorder %s141_s24, %s141_s24 }
  0x18   :  { %v30_v4 = vrot.slane %v29_v3, 2  ;;  %p148_p11 = por %p147_p10, %p146_p9 }
  0x1a   :  { %v31_v5 = vmax.f32 %v29_v3, %v30_v4  ;;  %p149_p12 = pnand %p148_p11, %p142_p8 }
  0x1c   :  { %v32_v6 = vrot.slane %v31_v5, 1 }
  0x1e   :  { %v33_v7 = vmax.f32 %v31_v5, %v32_v6 }
  0x20   :  { %v34_v8 = vsub.f32 %v24_v0, %v33_v7 }
  0x22   :  { %v35_v9 = vmul.f32 1.442695, %v34_v8 }
  0x24   :  { %115 = vpow2.f32 %v35_v9 }
  0x2e   :  { %v116_v13 = vpop.eup %115 }
  0x2f   :  { %v37_v14 = vsel %vm26_vm0, %v116_v13, 0.0  ;;  %v52_v15 = vsel %vm51_vm1, %v116_v13, 0.0  ;;  %v60_v16 = vmul.f32 %v116_v13, %v116_v13 }
  0x30   :  { %v38_v17 = vrot.slane %v37_v14, 4  ;;  %v53_v18 = vsel %vm26_vm0, %v52_v15, 0.0 }
  0x31   :  { %v54_v19 = vrot.slane %v53_v18, 4  ;;  %v61_v20 = vsel %vm26_vm0, %v60_v16, 0.0 }
  0x32   :  { %v39_v21 = vadd.f32 %v38_v17, %v37_v14  ;;  %v62_v22 = vrot.slane %v61_v20, 4 }
  0x33   :  { %v55_v23 = vadd.f32 %v54_v19, %v53_v18 }
  0x34   :  { %v40_v24 = vrot.slane %v39_v21, 2  ;;  %v63_v25 = vadd.f32 %v62_v22, %v61_v20 }
  0x35   :  { %v56_v27 = vrot.slane %v55_v23, 2 }
  0x36   :  { %v41_v26 = vadd.f32 %v40_v24, %v39_v21  ;;  %v64_v29 = vrot.slane %v63_v25, 2 }
  0x37   :  { %v57_v31 = vadd.f32 %v56_v27, %v55_v23 }
  0x38   :  { %v42_v28 = vrot.slane %v41_v26, 1  ;;  %v65_v32 = vadd.f32 %v64_v29, %v63_v25 }
  0x39   :  { %v58_v33 = vrot.slane %v57_v31, 1 }
  0x3a   :  { %v43_v30 = vadd.f32 %v42_v28, %v41_v26  ;;  %v66_v34 = vrot.slane %v65_v32, 1 }
  0x3b   :  { %v59_v35 = vadd.f32 %v58_v33, %v57_v31 }
  0x3c   :  { %117 = vrcp.f32 %v43_v30  ;;  %v67_v36 = vadd.f32 %v66_v34, %v65_v32 }
  0x46   :  { %v118_v37 = vpop.eup %117 }
  0x47   :  { %v68_v38 = vmul.f32 %v118_v37, %v118_v37  ;;  %v70_v39 = vmul.f32 %v118_v37, %v59_v35 }
  0x49   :  { %v69_v41 = vmul.f32 %v68_v38, %v67_v36  ;;  %v71_v42 = vmul.f32 2.0, %v70_v39 }
  0x4b   :  { %v72_v43 = vsub.f32 %v69_v41, %v71_v42 }
  0x4d   :  { %v73_v44 = vadd.f32 1.0, %v72_v43 }
  0x4f   :  { %v80_v45 = vsel %vm79_vm2, %v73_v44, 0.0 }
  0x50   :  { %v82_v46 = vsel %vm81_vm3, %v80_v45, 0.0 }
  0x51   :  { %83 = vadd.xlane.f32.xlu0 %v82_v46 }
  0xde   :  { %v84_v47 = vpop.xlane.xlu0 %83 }
  0xdf   :  { %v85_v48 = vrot.slane %v84_v47, 4 }
  0xe1   :  { %v86_v49 = vadd.f32 %v85_v48, %v84_v47 }
  0xe3   :  { %v87_v50 = vrot.slane %v86_v49, 2 }
  0xe5   :  { %v88_v51 = vadd.f32 %v87_v50, %v86_v49 }
  0xe7   :  { %v89_v52 = vrot.slane %v88_v51, 1 }
  0xe9   :  { %v90_v53 = vadd.f32 %v89_v52, %v88_v51 }
  0xeb   :  { %111 = vpush %v90_v53 }
 0x11c   :  { %s112_s23 = spop %111 }
 0x11d   :  { %v92_v54 = vstv %s112_s23 }
 0x11e   :  { %94 = vst [vmem:[#allocation5] sm:$0xff] %v92_v54 }
 0x11f   :  { %152 = shalt.err (!%p149_p12)
}
 0x120   :  { %s153_s27 = scalar_lea.hbm %s217_s2, 128 }
 0x121   :  { %p154_p13 = scmp.ne.s32.totalorder %s217_s2, %s153_s27  ;;  %p157_p0 = scmp.lt.u32.totalorder %s153_s27, %s217_s2 }
 0x123   :  { %p159_p1 = pnand %p157_p0, %p154_p13 }
 0x125   :  { %162 = shalt.err (!%p159_p1)
}
 0x126   :  { %104 = dma.vmem_to_hbm [thread:$0]  %s102_s1, 128, %s217_s2, [#allocation4]  }
 0x127   :  { %165 = dma.done.wait [#allocation4], 128  }
 0x128   :  { %166 = vsyncadd [#allocation4], 4294967168 }
 0x129   :  { %108 = vsyncpa [#allocation3], 1 }
 0x12a   :  { %109 = vsyncpa [#allocation4], 1 }

</bundles_post_ra>
